<compile_context>
chip_gen: v7x
topology: tpu7x:2x2x1
jax: 0.10.0
libtpu: 0.0.40
codegen_flags: <defaults>
</compile_context>

<pallas_src>
import jax
import jax.numpy as jnp
from jax.experimental import pallas as pl
from jax.experimental.pallas import tpu as pltpu  # noqa: F401  (TPU backend, kept for parity)


def gcn_kernel(a_ref, x_ref, w1_ref, b1_ref, w2_ref, b2_ref, r_ref, out_ref):
    # a_ref: [B*N, B*N] block-diagonal normalized adjacency (whole batch)
    # x_ref: [B*N, F] flattened node features
    # r_ref: [B, B*N]  per-graph mean-readout matrix (1/N on each graph's node segment)
    a = a_ref[...]

    # ---- GraphConv 1: aggregate-first (F < H): relu((A @ X) @ W1 + b1) ----
    ax = jnp.dot(a, x_ref[...], preferred_element_type=jnp.float32)          # [B*N, F]
    h1 = jnp.dot(ax, w1_ref[...], preferred_element_type=jnp.float32) + b1_ref[...]
    h1 = jnp.maximum(h1, 0.0)                                                # [B*N, H]

    # ---- GraphConv 2: weight-first (H > C): relu(A @ (h1 @ W2) + b2) ----
    hw = jnp.dot(h1, w2_ref[...], preferred_element_type=jnp.float32)        # [B*N, C]
    h2 = jnp.dot(a, hw, preferred_element_type=jnp.float32) + b2_ref[...]
    h2 = jnp.maximum(h2, 0.0)                                                # [B*N, C]

    # ---- dgl.mean_nodes folded into the MXU: R @ h2 -> [B, C] (single lane-dense write) ----
    out_ref[...] = jnp.dot(r_ref[...], h2, preferred_element_type=jnp.float32)


def gcn_forward(a_norm, x, w1, b1, w2, b2):
    """a_norm: [B,N,N], x: [B,N,F] -> per-graph readout [B, C]."""
    batch, n, _ = a_norm.shape
    f_in = x.shape[-1]
    h = w1.shape[1]
    c = w2.shape[1]
    bn = batch * n

    # Block-diagonal adjacency; off-diagonal (cross-graph) blocks are exactly zero.
    a_bd = jnp.zeros((bn, bn), jnp.float32)
    for i in range(batch):
        a_bd = a_bd.at[i * n:(i + 1) * n, i * n:(i + 1) * n].set(a_norm[i])
    x_flat = x.reshape(bn, f_in)

    # Precomputed per-graph averaging matrix: row b has 1/N over that graph's node segment.
    readout = jnp.kron(jnp.eye(batch, dtype=jnp.float32),
                       jnp.full((1, n), 1.0 / n, dtype=jnp.float32))          # [B, B*N]

    flops = 2 * (bn * bn * f_in        # A @ X
                 + bn * f_in * h       # (.) @ W1
                 + bn * h * c          # h1 @ W2
                 + bn * bn * c         # A @ (.)
                 + batch * bn * c)     # readout
    bytes_accessed = 4 * (bn * bn + bn * f_in + f_in * h + h + h * c + c
                          + batch * bn + batch * c)

    out = pl.pallas_call(
        gcn_kernel,
        out_shape=jax.ShapeDtypeStruct((batch, c), jnp.float32),
        cost_estimate=pl.CostEstimate(flops=flops, transcendentals=0,
                                      bytes_accessed=bytes_accessed),
    )(a_bd, x_flat, w1, b1, w2, b2, readout)
    return out                                                                # [B, C]


def build_normalized_adjacency(key, n):
    # Deterministic synthetic graph: ring (degree >= 2) + random extra edges, no self-loops.
    ring = jnp.zeros((n, n), jnp.float32)
    idx = jnp.arange(n)
    ring = ring.at[idx, (idx + 1) % n].set(1.0)
    ring = ring.at[(idx + 1) % n, idx].set(1.0)

    rnd = jax.random.bernoulli(key, p=0.2, shape=(n, n)).astype(jnp.float32)
    rnd = jnp.triu(rnd, k=1)
    adj = jnp.clip(ring + rnd + rnd.T, 0.0, 1.0)
    adj = adj * (1.0 - jnp.eye(n, dtype=jnp.float32))

    # DGL GraphConv norm='both': deg^-0.5, with 0 for zero-degree nodes.
    deg = jnp.sum(adj, axis=1)
    deg_safe = jnp.where(deg > 0.0, deg, 1.0)
    d_inv_sqrt = jnp.where(deg > 0.0, 1.0 / jnp.sqrt(deg_safe), 0.0)
    return adj * d_inv_sqrt[:, None] * d_inv_sqrt[None, :]


if __name__ == "__main__":
    # B graphs of N nodes each; in_feats -> h_feats -> num_classes.
    B, N, IN_FEATS, H_FEATS, NUM_CLASSES = 8, 16, 8, 32, 4

    key = jax.random.PRNGKey(0)
    k_adj, k_x, k_w1, k_w2 = jax.random.split(key, 4)

    adj_keys = jax.random.split(k_adj, B)
    a_norm = jnp.stack([build_normalized_adjacency(adj_keys[i], N) for i in range(B)])  # [B,N,N]
    x = jax.random.normal(k_x, (B, N, IN_FEATS), dtype=jnp.float32)                     # [B,N,F]

    # Deterministic Glorot-uniform-style init (DGL GraphConv default), biases zero.
    def glorot(k, fan_in, fan_out):
        limit = jnp.sqrt(6.0 / (fan_in + fan_out))
        return jax.random.uniform(k, (fan_in, fan_out), jnp.float32, -limit, limit)

    w1 = glorot(k_w1, IN_FEATS, H_FEATS)
    b1 = jnp.zeros((1, H_FEATS), jnp.float32)
    w2 = glorot(k_w2, H_FEATS, NUM_CLASSES)
    b2 = jnp.zeros((1, NUM_CLASSES), jnp.float32)

    out = gcn_forward(a_norm, x, w1, b1, w2, b2)
    jax.block_until_ready(out)

    # Pure-JAX reference of the same math (high-precision matmuls to match MXU f32 path).
    hp = jax.lax.Precision.HIGHEST
    mm = lambda a, b: jnp.matmul(a, b, precision=hp)
    h1_ref = jnp.maximum(mm(a_norm, mm(x, w1)) + b1, 0.0)          # [B,N,H]
    h2_ref = jnp.maximum(mm(a_norm, mm(h1_ref, w2)) + b2, 0.0)     # [B,N,C]
    ref = jnp.mean(h2_ref, axis=1)                                 # [B,C]

    assert out.shape == (B, NUM_CLASSES)
    assert jnp.allclose(out, ref, atol=1e-4, rtol=1e-4)

    print("KERNEL_OK")
</pallas_src>

<mosaic_0001>
module attributes {stable_mosaic.version = 11 : i64} {
  func.func @gcn_kernel(%arg0: memref<128x128xf32, #tpu.memory_space<vmem>>, %arg1: memref<128x8xf32, #tpu.memory_space<vmem>>, %arg2: memref<8x32xf32, #tpu.memory_space<vmem>>, %arg3: memref<1x32xf32, #tpu.memory_space<vmem>>, %arg4: memref<32x4xf32, #tpu.memory_space<vmem>>, %arg5: memref<1x4xf32, #tpu.memory_space<vmem>>, %arg6: memref<8x128xf32, #tpu.memory_space<vmem>>, %arg7: memref<8x4xf32, #tpu.memory_space<vmem>>) attributes {dimension_semantics = [], scalar_prefetch = 0 : i64, scratch_operands = 0 : i64, tpu.core_type = #tpu.core_type<tc>} {
    %c0 = arith.constant 0 : index
    %c0_0 = arith.constant 0 : index
    %0 = vector.load %arg0[%c0, %c0_0] : memref<128x128xf32, #tpu.memory_space<vmem>>, vector<128x128xf32>
    %c0_1 = arith.constant 0 : index
    %c0_2 = arith.constant 0 : index
    %1 = vector.load %arg1[%c0_1, %c0_2] : memref<128x8xf32, #tpu.memory_space<vmem>>, vector<128x8xf32>
    %cst = arith.constant dense<0.000000e+00> : vector<128x8xf32>
    %2 = tpu.matmul %0, %1, %cst {dimension_numbers = #tpu.dot_dimension_numbers<[1], [0], [0], [1], [0, 0, 1, 1], [], []>} : vector<128x128xf32>, vector<128x8xf32>, vector<128x8xf32> -> vector<128x8xf32>
    %c0_3 = arith.constant 0 : index
    %c0_4 = arith.constant 0 : index
    %3 = vector.load %arg2[%c0_3, %c0_4] : memref<8x32xf32, #tpu.memory_space<vmem>>, vector<8x32xf32>
    %cst_5 = arith.constant dense<0.000000e+00> : vector<128x32xf32>
    %4 = tpu.matmul %2, %3, %cst_5 {dimension_numbers = #tpu.dot_dimension_numbers<[1], [0], [0], [1], [0, 0, 1, 1], [], []>} : vector<128x8xf32>, vector<8x32xf32>, vector<128x32xf32> -> vector<128x32xf32>
    %c0_6 = arith.constant 0 : index
    %c0_7 = arith.constant 0 : index
    %5 = vector.load %arg3[%c0_6, %c0_7] : memref<1x32xf32, #tpu.memory_space<vmem>>, vector<1x32xf32>
    %6 = vector.broadcast %5 : vector<1x32xf32> to vector<128x32xf32>
    %7 = arith.addf %4, %6 : vector<128x32xf32>
    %cst_8 = arith.constant 0.000000e+00 : f32
    %8 = vector.broadcast %cst_8 : f32 to vector<128x32xf32>
    %9 = arith.maximumf %7, %8 : vector<128x32xf32>
    %c0_9 = arith.constant 0 : index
    %c0_10 = arith.constant 0 : index
    %10 = vector.load %arg4[%c0_9, %c0_10] : memref<32x4xf32, #tpu.memory_space<vmem>>, vector<32x4xf32>
    %cst_11 = arith.constant dense<0.000000e+00> : vector<128x4xf32>
    %11 = tpu.matmul %9, %10, %cst_11 {dimension_numbers = #tpu.dot_dimension_numbers<[1], [0], [0], [1], [0, 0, 1, 1], [], []>} : vector<128x32xf32>, vector<32x4xf32>, vector<128x4xf32> -> vector<128x4xf32>
    %cst_12 = arith.constant dense<0.000000e+00> : vector<128x4xf32>
    %12 = tpu.matmul %0, %11, %cst_12 {dimension_numbers = #tpu.dot_dimension_numbers<[1], [0], [0], [1], [0, 0, 1, 1], [], []>} : vector<128x128xf32>, vector<128x4xf32>, vector<128x4xf32> -> vector<128x4xf32>
    %c0_13 = arith.constant 0 : index
    %c0_14 = arith.constant 0 : index
    %13 = vector.load %arg5[%c0_13, %c0_14] : memref<1x4xf32, #tpu.memory_space<vmem>>, vector<1x4xf32>
    %14 = vector.broadcast %13 : vector<1x4xf32> to vector<128x4xf32>
    %15 = arith.addf %12, %14 : vector<128x4xf32>
    %cst_15 = arith.constant 0.000000e+00 : f32
    %16 = vector.broadcast %cst_15 : f32 to vector<128x4xf32>
    %17 = arith.maximumf %15, %16 : vector<128x4xf32>
    %c0_16 = arith.constant 0 : index
    %c0_17 = arith.constant 0 : index
    %18 = vector.load %arg6[%c0_16, %c0_17] : memref<8x128xf32, #tpu.memory_space<vmem>>, vector<8x128xf32>
    %cst_18 = arith.constant dense<0.000000e+00> : vector<8x4xf32>
    %19 = tpu.matmul %18, %17, %cst_18 {dimension_numbers = #tpu.dot_dimension_numbers<[1], [0], [0], [1], [0, 0, 1, 1], [], []>} : vector<8x128xf32>, vector<128x4xf32>, vector<8x4xf32> -> vector<8x4xf32>
    %c0_19 = arith.constant 0 : index
    %c0_20 = arith.constant 0 : index
    %20 = vector.load %arg7[%c0_19, %c0_20] : memref<8x4xf32, #tpu.memory_space<vmem>>, vector<8x4xf32>
    tpu.vector_store %arg7[%c0_19, %c0_20], %19 {strides = array<i32>} : memref<8x4xf32, #tpu.memory_space<vmem>>, vector<8x4xf32>,
    return
  }
}

</mosaic_0001>

<bundles_post_ra>
// kernel: tpu_custom_call.1
= control target key start
LH: loop header
LB: loop body
LE: loop exit
PB: predicated region body
PF: predicated region fallthrough
CT: control target
= control target key end

     0   :  { %vm211_vm0 = vcmask 64512   ;;  %vm425_vm1 = vcmask 261120   ;;  %vm1321_vm2 = vmmov 0   ;;  %vm858_vm3 = vcmask 31744   ;;  %s1604_s1 = inlined_call_operand.vmem [shape: f32[128,8], index: 1, kind: input, shape index: {}]   ;;  %s1605_s0 = inlined_call_operand.vmem [shape: f32[128,128], index: 0, kind: input, shape index: {}]   ;;  %s1606_s2 = inlined_call_operand.vmem [shape: f32[8,32], index: 2, kind: input, shape index: {}]   ;;  %s1607_s4 = inlined_call_operand.vmem [shape: f32[32,4], index: 4, kind: input, shape index: {}]   ;;  %s1608_s3 = inlined_call_operand.vmem [shape: f32[1,32], index: 3, kind: input, shape index: {}]   ;;  %s1609_s5 = inlined_call_operand.vmem [shape: f32[1,4], index: 5, kind: input, shape index: {}]   ;;  %s1610_s6 = inlined_call_operand.vmem [shape: f32[8,128], index: 6, kind: input, shape index: {}]   ;;  %s1611_s7 = inlined_call_operand.vmem [shape: f32[8,4], index: 7, kind: output, shape index: {}]  }
   0x1   :  { %v42_v0 = vld [vmem:[%s1604_s1] sm:$0xff]  ;;  %v43_v1 = vld [vmem:[%s1604_s1 + $0x8] sm:$0xff]  ;;  %v44_v2 = vld [vmem:[%s1604_s1 + $0x10] sm:$0xff] }
   0x2   :  { %v1221_v3 = vpack.c.bf16 %v43_v1, %v42_v0  ;;  %v45_v4 = vld [vmem:[%s1604_s1 + $0x18] sm:$0xff]  ;;  %v46_v6 = vld [vmem:[%s1604_s1 + $0x20] sm:$0xff]  ;;  %v47_v7 = vld [vmem:[%s1604_s1 + $0x28] sm:$0xff] }
   0x3   :  { %v1225_v5 = vpack.c.bf16 %v45_v4, %v44_v2  ;;  %v1229_v8 = vpack.c.bf16 %v47_v7, %v46_v6  ;;  %v26_v9 = vld [vmem:[%s1605_s0] sm:$0xff]  ;;  %v48_v10 = vld [vmem:[%s1604_s1 + $0x30] sm:$0xff]  ;;  %v49_v11 = vld [vmem:[%s1604_s1 + $0x38] sm:$0xff] }
   0x4   :  { %1222 = vmatprep.subr.bf16.mxu0 %v1221_v3  ;;  %1048 = vmatprep.mubr.f32.mxu0 %v26_v9  ;;  %v1233_v12 = vpack.c.bf16 %v49_v11, %v48_v10  ;;  %v50_v13 = vld [vmem:[%s1604_s1 + $0x40] sm:$0xff]  ;;  %v51_v14 = vld [vmem:[%s1604_s1 + $0x48] sm:$0xff]  ;;  %v52_v16 = vld [vmem:[%s1604_s1 + $0x50] sm:$0xff] }
   0x5   :  { %1224 = vmatpush3.bf16.msra.mxu0 %v1221_v3  ;;  %v1237_v15 = vpack.c.bf16 %v51_v14, %v50_v13  ;;  %v53_v17 = vld [vmem:[%s1604_s1 + $0x58] sm:$0xff]  ;;  %v54_v19 = vld [vmem:[%s1604_s1 + $0x60] sm:$0xff]  ;;  %v55_v20 = vld [vmem:[%s1604_s1 + $0x68] sm:$0xff] }
   0x6   :  { %1226 = vmatprep.subr.bf16.mxu0 %v1225_v5  ;;  %v1241_v18 = vpack.c.bf16 %v53_v17, %v52_v16  ;;  %v1245_v21 = vpack.c.bf16 %v55_v20, %v54_v19  ;;  %v56_v22 = vld [vmem:[%s1604_s1 + $0x70] sm:$0xff]  ;;  %v57_v23 = vld [vmem:[%s1604_s1 + $0x78] sm:$0xff]  ;;  %v1417_v25 = vld [vmem:[%s1605_s0 + $0x8] sm:$0xff] }
   0x7   :  { %v1249_v24 = vpack.c.bf16 %v57_v23, %v56_v22  ;;  %v1422_v26 = vld [vmem:[%s1605_s0 + $0x10] sm:$0xff]  ;;  %v1429_v27 = vld [vmem:[%s1605_s0 + $0x18] sm:$0xff]  ;;  %v1434_v28 = vld [vmem:[%s1605_s0 + $0x20] sm:$0xff] }
   0x8   :  { %v1441_v29 = vld [vmem:[%s1605_s0 + $0x28] sm:$0xff]  ;;  %v1446_v30 = vld [vmem:[%s1605_s0 + $0x30] sm:$0xff]  ;;  %v1453_v31 = vld [vmem:[%s1605_s0 + $0x38] sm:$0xff] }
   0x9   :  { %1228 = vmatpush3.bf16.msra.mxu0 %v1225_v5  ;;  %v1458_v32 = vld [vmem:[%s1605_s0 + $0x40] sm:$0xff]  ;;  %v1465_v33 = vld [vmem:[%s1605_s0 + $0x48] sm:$0xff]  ;;  %v1470_v34 = vld [vmem:[%s1605_s0 + $0x50] sm:$0xff] }
   0xa   :  { %1230 = vmatprep.subr.bf16.mxu0 %v1229_v8  ;;  %v1477_v35 = vld [vmem:[%s1605_s0 + $0x58] sm:$0xff]  ;;  %v1482_v36 = vld [vmem:[%s1605_s0 + $0x60] sm:$0xff]  ;;  %v1489_v37 = vld [vmem:[%s1605_s0 + $0x68] sm:$0xff] }
   0xb   :  { %v1494_v38 = vld [vmem:[%s1605_s0 + $0x70] sm:$0xff]  ;;  %v1501_v39 = vld [vmem:[%s1605_s0 + $0x78] sm:$0xff]  ;;  %v203_v40 = vld [vmem:[%s1606_s2] sm:$0xff] }
   0xc   :  { %1072 = vmatprep.subr.mxu1 %v203_v40  ;;  %v421_v41 = vld [vmem:[%s1607_s4] sm:$0xff]  ;;  %v422_v42 = vld [vmem:[%s1607_s4 + $0x8] sm:$0xff]  ;;  %v423_v44 = vld [vmem:[%s1607_s4 + $0x10] sm:$0xff] }
   0xd   :  { %1232 = vmatpush3.bf16.msra.mxu0 %v1229_v8  ;;  %1073 = vmatpush3.msra.mxu1 %v203_v40  ;;  %v1253_v43 = vpack.c.bf16 %v422_v42, %v421_v41  ;;  %v424_v45 = vld [vmem:[%s1607_s4 + $0x18] sm:$0xff]  ;;  %v864_v63 = vld [vmem:[%s1608_s3] ss:$0 sm:$0xff] }
   0xe   :  { %1234 = vmatprep.subr.bf16.mxu0 %v1233_v12  ;;  %v1257_v48 = vpack.c.bf16 %v424_v45, %v423_v44 }
   0xf   :  { %1254 = vmatprep.subr.bf16.mxu1 %v1253_v43 }
  0x11   :  { %1236 = vmatpush3.bf16.msra.mxu0 %v1233_v12 }
  0x12   :  { %1238 = vmatprep.subr.bf16.mxu0 %v1237_v15 }
  0x15   :  { %1240 = vmatpush3.bf16.msra.mxu0 %v1237_v15 }
  0x16   :  { %1242 = vmatprep.subr.bf16.mxu0 %v1241_v18 }
  0x19   :  { %1244 = vmatpush3.bf16.msra.mxu0 %v1241_v18 }
  0x1a   :  { %1246 = vmatprep.subr.bf16.mxu0 %v1245_v21 }
  0x1d   :  { %1248 = vmatpush3.bf16.msra.mxu0 %v1245_v21 }
  0x1e   :  { %1250 = vmatprep.subr.bf16.mxu0 %v1249_v24 }
  0x21   :  { %1252 = vmatpush3.bf16.msra.mxu0 %v1249_v24 }
  0x24   :  { %1049 = vmatmul.mubr.f32.vlgmr.msra.gmra.mrb[0].mxu0 %v1417_v25 }
  0x25   :  { %1051 = vmatprep.mubr.f32.mxu0 %v1422_v26 }
  0x28   :  { %1052 = vmatmul.mubr.f32.gmra.mrb[2].mxu0 %v1429_v27 }
  0x29   :  { %1054 = vmatprep.mubr.f32.mxu0 %v1434_v28 }
  0x2c   :  { %1055 = vmatmul.mubr.f32.gmra.mrb[4].mxu0 %v1441_v29 }
  0x2d   :  { %1057 = vmatprep.mubr.f32.mxu0 %v1446_v30 }
  0x30   :  { %1058 = vmatmul.mubr.f32.gmra.mrb[6].mxu0 %v1453_v31 }
  0x31   :  { %1060 = vmatprep.mubr.f32.mxu0 %v1458_v32 }
  0x34   :  { %1061 = vmatmul.mubr.f32.gmra.mrb[8].mxu0 %v1465_v33 }
  0x35   :  { %1063 = vmatprep.mubr.f32.mxu0 %v1470_v34 }
  0x38   :  { %1064 = vmatmul.mubr.f32.gmra.mrb[10].mxu0 %v1477_v35 }
  0x39   :  { %1066 = vmatprep.mubr.f32.mxu0 %v1482_v36 }
  0x3c   :  { %1067 = vmatmul.mubr.f32.gmra.mrb[12].mxu0 %v1489_v37 }
  0x3d   :  { %1069 = vmatprep.mubr.f32.mxu0 %v1494_v38 }
  0x40   :  { %1070 = vmatmul.mubr.f32.gmra.mrb[14].mxu0 %v1501_v39 }
  0x41   :  { %1162 = vmatprep.mubr.f32.mxu0 %v26_v9 }
  0xf7   :  { %v1050_v46 = vpop.f32.mrb[0].mxu0 }
  0xf8   :  { %v124_v47 = vpop.f32.mrb[1].mxu0 }
  0xf9   :  { %1074 = vmatprep.mubr.msk.f32.mxu1 %vm211_vm0, %v124_v47 }
  0xfa   :  { %1075 = vmatmul.mubr.msk.f32.vlgmr.msra.gmra.mrb[0].mxu1 %vm211_vm0, %v1050_v46 }
  0xfb   :  { %v1053_v49 = vpop.f32.mrb[2].mxu0  ;;  %1256 = vmatpush3.bf16.msra.mxu1 %v1253_v43 }
  0xfc   :  { %v134_v50 = vpop.f32.mrb[3].mxu0  ;;  %1258 = vmatprep.subr.bf16.mxu1 %v1257_v48 }
  0xfd   :  { %1077 = vmatprep.mubr.msk.f32.mxu1 %vm211_vm0, %v134_v50 }
  0xfe   :  { %1078 = vmatmul.mubr.msk.f32.gmra.mrb[2].mxu1 %vm211_vm0, %v1053_v49 }
  0xff   :  { %v1056_v51 = vpop.f32.mrb[4].mxu0  ;;  %1260 = vmatpush3.bf16.msra.mxu1 %v1257_v48 }
 0x100   :  { %v144_v52 = vpop.f32.mrb[5].mxu0 }
 0x101   :  { %1080 = vmatprep.mubr.msk.f32.mxu1 %vm211_vm0, %v144_v52 }
 0x102   :  { %1081 = vmatmul.mubr.msk.f32.gmra.mrb[4].mxu1 %vm211_vm0, %v1056_v51 }
 0x103   :  { %v1059_v53 = vpop.f32.mrb[6].mxu0 }
 0x104   :  { %v154_v54 = vpop.f32.mrb[7].mxu0 }
 0x105   :  { %1083 = vmatprep.mubr.msk.f32.mxu1 %vm211_vm0, %v154_v54 }
 0x106   :  { %1084 = vmatmul.mubr.msk.f32.gmra.mrb[6].mxu1 %vm211_vm0, %v1059_v53 }
 0x107   :  { %v1062_v55 = vpop.f32.mrb[8].mxu0 }
 0x108   :  { %v164_v56 = vpop.f32.mrb[9].mxu0 }
 0x109   :  { %1086 = vmatprep.mubr.msk.f32.mxu1 %vm211_vm0, %v164_v56 }
 0x10a   :  { %1087 = vmatmul.mubr.msk.f32.gmra.mrb[8].mxu1 %vm211_vm0, %v1062_v55 }
 0x10b   :  { %v1065_v57 = vpop.f32.mrb[10].mxu0 }
 0x10c   :  { %v174_v58 = vpop.f32.mrb[11].mxu0 }
 0x10d   :  { %1089 = vmatprep.mubr.msk.f32.mxu1 %vm211_vm0, %v174_v58 }
 0x10e   :  { %1090 = vmatmul.mubr.msk.f32.gmra.mrb[10].mxu1 %vm211_vm0, %v1065_v57 }
 0x10f   :  { %v1068_v59 = vpop.f32.mrb[12].mxu0 }
 0x110   :  { %v184_v60 = vpop.f32.mrb[13].mxu0 }
 0x111   :  { %1092 = vmatprep.mubr.msk.f32.mxu1 %vm211_vm0, %v184_v60 }
 0x112   :  { %1093 = vmatmul.mubr.msk.f32.gmra.mrb[12].mxu1 %vm211_vm0, %v1068_v59 }
 0x113   :  { %v1071_v61 = vpop.f32.mrb[14].mxu0 }
 0x114   :  { %v194_v62 = vpop.f32.mrb[15].mxu0 }
 0x115   :  { %1095 = vmatprep.mubr.msk.f32.mxu1 %vm211_vm0, %v194_v62 }
 0x116   :  { %1096 = vmatmul.mubr.msk.f32.gmra.mrb[14].mxu1 %vm211_vm0, %v1071_v61 }
 0x1cd   :  { %v1076_v0 = vpop.f32.mrb[0].mxu1 }
 0x1ce   :  { %v332_v1 = vadd.f32 %v1076_v0, %v864_v63  ;;  %v326_v2 = vpop.f32.mrb[1].mxu1 }
 0x1cf   :  { %v327_v3 = vadd.f32 %v864_v63, %v326_v2 }
 0x1d0   :  { %v406_v6 = vmax.f32 %v332_v1, 0.0 }
 0x1d1   :  { %v405_v4 = vmax.f32 %v327_v3, 0.0  ;;  %v1079_v5 = vpop.f32.mrb[2].mxu1 }
 0x1d2   :  { %v342_v7 = vadd.f32 %v1079_v5, %v864_v63  ;;  %v336_v8 = vpop.f32.mrb[3].mxu1 }
 0x1d3   :  { %v337_v9 = vadd.f32 %v864_v63, %v336_v8  ;;  %1106 = vmatprep.mubr.msk.f32.mxu1 %vm425_vm1, %v405_v4 }
 0x1d4   :  { %1107 = vmatmul.mubr.msk.f32.vlgmr.msra.gmra.mrb[16].mxu1 %vm425_vm1, %v406_v6  ;;  %v408_v12 = vmax.f32 %v342_v7, 0.0 }
 0x1d5   :  { %v407_v10 = vmax.f32 %v337_v9, 0.0  ;;  %v1082_v11 = vpop.f32.mrb[4].mxu1 }
 0x1d6   :  { %v352_v13 = vadd.f32 %v1082_v11, %v864_v63  ;;  %v346_v14 = vpop.f32.mrb[5].mxu1 }
 0x1d7   :  { %v347_v15 = vadd.f32 %v864_v63, %v346_v14  ;;  %1109 = vmatprep.mubr.msk.f32.mxu1 %vm425_vm1, %v407_v10 }
 0x1d8   :  { %1110 = vmatmul.mubr.msk.f32.gmra.mrb[18].mxu1 %vm425_vm1, %v408_v12  ;;  %v410_v18 = vmax.f32 %v352_v13, 0.0 }
 0x1d9   :  { %v409_v16 = vmax.f32 %v347_v15, 0.0  ;;  %v1085_v17 = vpop.f32.mrb[6].mxu1 }
 0x1da   :  { %v362_v19 = vadd.f32 %v1085_v17, %v864_v63  ;;  %v356_v20 = vpop.f32.mrb[7].mxu1 }
 0x1db   :  { %v357_v21 = vadd.f32 %v864_v63, %v356_v20  ;;  %1112 = vmatprep.mubr.msk.f32.mxu1 %vm425_vm1, %v409_v16 }
 0x1dc   :  { %1113 = vmatmul.mubr.msk.f32.gmra.mrb[20].mxu1 %vm425_vm1, %v410_v18  ;;  %v412_v24 = vmax.f32 %v362_v19, 0.0 }
 0x1dd   :  { %v411_v22 = vmax.f32 %v357_v21, 0.0  ;;  %v1088_v23 = vpop.f32.mrb[8].mxu1 }
 0x1de   :  { %v372_v40 = vadd.f32 %v1088_v23, %v864_v63  ;;  %v366_v41 = vpop.f32.mrb[9].mxu1 }
 0x1df   :  { %v367_v42 = vadd.f32 %v864_v63, %v366_v41  ;;  %1115 = vmatprep.mubr.msk.f32.mxu1 %vm425_vm1, %v411_v22 }
 0x1e0   :  { %1116 = vmatmul.mubr.msk.f32.gmra.mrb[22].mxu1 %vm425_vm1, %v412_v24  ;;  %v414_v45 = vmax.f32 %v372_v40, 0.0 }
 0x1e1   :  { %v413_v43 = vmax.f32 %v367_v42, 0.0  ;;  %v1091_v44 = vpop.f32.mrb[10].mxu1 }
 0x1e2   :  { %v382_v46 = vadd.f32 %v1091_v44, %v864_v63  ;;  %v376_v47 = vpop.f32.mrb[11].mxu1 }
 0x1e3   :  { %v377_v48 = vadd.f32 %v864_v63, %v376_v47  ;;  %1118 = vmatprep.mubr.msk.f32.mxu1 %vm425_vm1, %v413_v43 }
 0x1e4   :  { %1119 = vmatmul.mubr.msk.f32.gmra.mrb[24].mxu1 %vm425_vm1, %v414_v45  ;;  %v416_v51 = vmax.f32 %v382_v46, 0.0 }
 0x1e5   :  { %v415_v49 = vmax.f32 %v377_v48, 0.0  ;;  %v1094_v50 = vpop.f32.mrb[12].mxu1 }
 0x1e6   :  { %v392_v52 = vadd.f32 %v1094_v50, %v864_v63  ;;  %v386_v53 = vpop.f32.mrb[13].mxu1 }
 0x1e7   :  { %v387_v54 = vadd.f32 %v864_v63, %v386_v53  ;;  %1121 = vmatprep.mubr.msk.f32.mxu1 %vm425_vm1, %v415_v49 }
 0x1e8   :  { %1122 = vmatmul.mubr.msk.f32.gmra.mrb[26].mxu1 %vm425_vm1, %v416_v51  ;;  %v418_v57 = vmax.f32 %v392_v52, 0.0 }
 0x1e9   :  { %v417_v55 = vmax.f32 %v387_v54, 0.0  ;;  %v1097_v56 = vpop.f32.mrb[14].mxu1 }
 0x1ea   :  { %v402_v58 = vadd.f32 %v1097_v56, %v864_v63  ;;  %v396_v59 = vpop.f32.mrb[15].mxu1 }
 0x1eb   :  { %v397_v60 = vadd.f32 %v864_v63, %v396_v59  ;;  %1124 = vmatprep.mubr.msk.f32.mxu1 %vm425_vm1, %v417_v55 }
 0x1ec   :  { %1125 = vmatmul.mubr.msk.f32.gmra.mrb[28].mxu1 %vm425_vm1, %v418_v57  ;;  %v420_v62 = vmax.f32 %v402_v58, 0.0 }
 0x1ed   :  { %v419_v61 = vmax.f32 %v397_v60, 0.0 }
 0x1ef   :  { %1127 = vmatprep.mubr.msk.f32.mxu1 %vm425_vm1, %v419_v61 }
 0x1f0   :  { %1128 = vmatmul.mubr.msk.f32.gmra.mrb[30].mxu1 %vm425_vm1, %v420_v62 }
 0x2a7   :  { %v1108_v0 = vpop.f32.mrb[16].mxu1 }
 0x2a8   :  { %v540_v1 = vpop.f32.mrb[17].mxu1 }
 0x2a9   :  { %v1261_v2 = vpack.c.bf16 %v1108_v0, %v540_v1 }
 0x2ab   :  { %v1111_v3 = vpop.f32.mrb[18].mxu1  ;;  %1262 = vmatprep.subr.bf16.mxu0 %v1261_v2 }
 0x2ac   :  { %v550_v4 = vpop.f32.mrb[19].mxu1  ;;  %1264 = vmatpush3.bf16.msra.mxu0 %v1261_v2 }
 0x2ad   :  { %v1265_v5 = vpack.c.bf16 %v1111_v3, %v550_v4 }
 0x2af   :  { %v1114_v6 = vpop.f32.mrb[20].mxu1  ;;  %1266 = vmatprep.subr.bf16.mxu0 %v1265_v5 }
 0x2b0   :  { %v560_v63 = vpop.f32.mrb[21].mxu1  ;;  %1268 = vmatpush3.bf16.msra.mxu0 %v1265_v5 }
 0x2b1   :  { %v1269_v7 = vpack.c.bf16 %v1114_v6, %v560_v63 }
 0x2b3   :  { %v1117_v8 = vpop.f32.mrb[22].mxu1  ;;  %1270 = vmatprep.subr.bf16.mxu0 %v1269_v7 }
 0x2b4   :  { %v570_v9 = vpop.f32.mrb[23].mxu1  ;;  %1272 = vmatpush3.bf16.msra.mxu0 %v1269_v7 }
 0x2b5   :  { %v1273_v10 = vpack.c.bf16 %v1117_v8, %v570_v9 }
 0x2b7   :  { %v1120_v11 = vpop.f32.mrb[24].mxu1  ;;  %1274 = vmatprep.subr.bf16.mxu0 %v1273_v10 }
 0x2b8   :  { %v580_v12 = vpop.f32.mrb[25].mxu1  ;;  %1276 = vmatpush3.bf16.msra.mxu0 %v1273_v10 }
 0x2b9   :  { %v1277_v13 = vpack.c.bf16 %v1120_v11, %v580_v12 }
 0x2bb   :  { %v1123_v14 = vpop.f32.mrb[26].mxu1  ;;  %1278 = vmatprep.subr.bf16.mxu0 %v1277_v13 }
 0x2bc   :  { %v590_v15 = vpop.f32.mrb[27].mxu1  ;;  %1280 = vmatpush3.bf16.msra.mxu0 %v1277_v13 }
 0x2bd   :  { %v1281_v16 = vpack.c.bf16 %v1123_v14, %v590_v15 }
 0x2bf   :  { %v1126_v17 = vpop.f32.mrb[28].mxu1  ;;  %1282 = vmatprep.subr.bf16.mxu0 %v1281_v16 }
 0x2c0   :  { %v600_v18 = vpop.f32.mrb[29].mxu1  ;;  %1284 = vmatpush3.bf16.msra.mxu0 %v1281_v16 }
 0x2c1   :  { %v1285_v19 = vpack.c.bf16 %v1126_v17, %v600_v18  ;;  %v787_v18 = vld [vmem:[%s1610_s6] sm:$0xff] }
 0x2c3   :  { %v1129_v20 = vpop.f32.mrb[30].mxu1  ;;  %1286 = vmatprep.subr.bf16.mxu0 %v1285_v19 }
 0x2c4   :  { %v610_v21 = vpop.f32.mrb[31].mxu1  ;;  %1288 = vmatpush3.bf16.msra.mxu0 %v1285_v19 }
 0x2c5   :  { %v1289_v22 = vpack.c.bf16 %v1129_v20, %v610_v21 }
 0x2c7   :  { %1290 = vmatprep.subr.bf16.mxu0 %v1289_v22 }
 0x2c8   :  { %1292 = vmatpush3.bf16.msra.mxu0 %v1289_v22 }
 0x2cb   :  { %1163 = vmatmul.mubr.f32.vlgmr.msra.gmra.mrb[16].mxu0 %v1417_v25  ;;  %v1320_v25 = vmov 0.0|0.0  }
 0x2cc   :  { %1165 = vmatprep.mubr.f32.mxu0 %v1422_v26  ;;  %1293 = vmatprep.subr.bf16.mxu1 %v1320_v25  ;;  %v1322_v26 = vmov 0.0  }
 0x2cd   :  { %1218 = vmatprep.mubr.msk.f32.mxu1 %vm1321_vm2, %v1322_v26 }
 0x2cf   :  { %1166 = vmatmul.mubr.f32.gmra.mrb[18].mxu0 %v1429_v27  ;;  %v1573_v27 = vld [vmem:[%s1609_s5] ss:$0 sm:$0xff] }
 0x2d0   :  { %1168 = vmatprep.mubr.f32.mxu0 %v1434_v28 }
 0x2d3   :  { %1169 = vmatmul.mubr.f32.gmra.mrb[20].mxu0 %v1441_v29 }
 0x2d4   :  { %1171 = vmatprep.mubr.f32.mxu0 %v1446_v30 }
 0x2d7   :  { %1172 = vmatmul.mubr.f32.gmra.mrb[22].mxu0 %v1453_v31 }
 0x2d8   :  { %1174 = vmatprep.mubr.f32.mxu0 %v1458_v32 }
 0x2db   :  { %1175 = vmatmul.mubr.f32.gmra.mrb[24].mxu0 %v1465_v33 }
 0x2dc   :  { %1177 = vmatprep.mubr.f32.mxu0 %v1470_v34 }
 0x2df   :  { %1178 = vmatmul.mubr.f32.gmra.mrb[26].mxu0 %v1477_v35 }
 0x2e0   :  { %1180 = vmatprep.mubr.f32.mxu0 %v1482_v36 }
 0x2e3   :  { %1181 = vmatmul.mubr.f32.gmra.mrb[28].mxu0 %v1489_v37 }
 0x2e4   :  { %1183 = vmatprep.mubr.f32.mxu0 %v1494_v38 }
 0x2e7   :  { %1184 = vmatmul.mubr.f32.gmra.mrb[30].mxu0 %v1501_v39 }
 0x39e   :  { %v1164_v28 = vpop.f32.mrb[16].mxu0 }
 0x39f   :  { %v698_v29 = vadd.f32 %v1164_v28, %v1573_v27  ;;  %v692_v30 = vpop.f32.mrb[17].mxu0 }
 0x3a0   :  { %v693_v31 = vadd.f32 %v1573_v27, %v692_v30 }
 0x3a1   :  { %v772_v32 = vmax.f32 %v698_v29, 0.0 }
 0x3a2   :  { %v771_v33 = vmax.f32 %v693_v31, 0.0  ;;  %v1167_v34 = vpop.f32.mrb[18].mxu0 }
 0x3a3   :  { %v708_v35 = vadd.f32 %v1167_v34, %v1573_v27  ;;  %v702_v36 = vpop.f32.mrb[19].mxu0 }
 0x3a4   :  { %v1294_v37 = vpack.c.bf16 %v772_v32, %v771_v33  ;;  %v703_v38 = vadd.f32 %v1573_v27, %v702_v36 }
 0x3a5   :  { %v774_v39 = vmax.f32 %v708_v35, 0.0 }
 0x3a6   :  { %v773_v23 = vmax.f32 %v703_v38, 0.0  ;;  %v1170_v24 = vpop.f32.mrb[20].mxu0  ;;  %1295 = vmatpush3.bf16.msra.mxu1 %v1294_v37 }
 0x3a7   :  { %v718_v40 = vadd.f32 %v1170_v24, %v1573_v27  ;;  %v712_v41 = vpop.f32.mrb[21].mxu0  ;;  %1296 = vmatprep.subr.bf16.mxu1 %v1320_v25 }
 0x3a8   :  { %v1297_v42 = vpack.c.bf16 %v774_v39, %v773_v23  ;;  %v713_v43 = vadd.f32 %v1573_v27, %v712_v41 }
 0x3a9   :  { %v776_v44 = vmax.f32 %v718_v40, 0.0 }
 0x3aa   :  { %v775_v45 = vmax.f32 %v713_v43, 0.0  ;;  %v1173_v46 = vpop.f32.mrb[22].mxu0  ;;  %1298 = vmatpush3.bf16.msra.mxu1 %v1297_v42 }
 0x3ab   :  { %v728_v47 = vadd.f32 %v1173_v46, %v1573_v27  ;;  %v722_v48 = vpop.f32.mrb[23].mxu0  ;;  %1299 = vmatprep.subr.bf16.mxu1 %v1320_v25 }
 0x3ac   :  { %v1300_v49 = vpack.c.bf16 %v776_v44, %v775_v45  ;;  %v723_v50 = vadd.f32 %v1573_v27, %v722_v48 }
 0x3ad   :  { %v778_v51 = vmax.f32 %v728_v47, 0.0 }
 0x3ae   :  { %v777_v52 = vmax.f32 %v723_v50, 0.0  ;;  %v1176_v53 = vpop.f32.mrb[24].mxu0  ;;  %1301 = vmatpush3.bf16.msra.mxu1 %v1300_v49 }
 0x3af   :  { %v738_v54 = vadd.f32 %v1176_v53, %v1573_v27  ;;  %v732_v55 = vpop.f32.mrb[25].mxu0  ;;  %1302 = vmatprep.subr.bf16.mxu1 %v1320_v25 }
 0x3b0   :  { %v1303_v56 = vpack.c.bf16 %v778_v51, %v777_v52  ;;  %v733_v57 = vadd.f32 %v1573_v27, %v732_v55 }
 0x3b1   :  { %v780_v58 = vmax.f32 %v738_v54, 0.0 }
 0x3b2   :  { %v779_v59 = vmax.f32 %v733_v57, 0.0  ;;  %v1179_v60 = vpop.f32.mrb[26].mxu0  ;;  %1304 = vmatpush3.bf16.msra.mxu1 %v1303_v56 }
 0x3b3   :  { %v748_v61 = vadd.f32 %v1179_v60, %v1573_v27  ;;  %v742_v62 = vpop.f32.mrb[27].mxu0  ;;  %1305 = vmatprep.subr.bf16.mxu1 %v1320_v25 }
 0x3b4   :  { %v1306_v0 = vpack.c.bf16 %v780_v58, %v779_v59  ;;  %v743_v1 = vadd.f32 %v1573_v27, %v742_v62 }
 0x3b5   :  { %v782_v2 = vmax.f32 %v748_v61, 0.0 }
 0x3b6   :  { %v781_v3 = vmax.f32 %v743_v1, 0.0  ;;  %v1182_v4 = vpop.f32.mrb[28].mxu0  ;;  %1307 = vmatpush3.bf16.msra.mxu1 %v1306_v0 }
 0x3b7   :  { %v758_v5 = vadd.f32 %v1182_v4, %v1573_v27  ;;  %v752_v6 = vpop.f32.mrb[29].mxu0  ;;  %1308 = vmatprep.subr.bf16.mxu1 %v1320_v25 }
 0x3b8   :  { %v1309_v63 = vpack.c.bf16 %v782_v2, %v781_v3  ;;  %v753_v7 = vadd.f32 %v1573_v27, %v752_v6 }
 0x3b9   :  { %v784_v8 = vmax.f32 %v758_v5, 0.0 }
 0x3ba   :  { %v783_v9 = vmax.f32 %v753_v7, 0.0  ;;  %v1185_v10 = vpop.f32.mrb[30].mxu0  ;;  %1310 = vmatpush3.bf16.msra.mxu1 %v1309_v63 }
 0x3bb   :  { %v768_v11 = vadd.f32 %v1185_v10, %v1573_v27  ;;  %v762_v12 = vpop.f32.mrb[31].mxu0  ;;  %1311 = vmatprep.subr.bf16.mxu1 %v1320_v25 }
 0x3bc   :  { %v1312_v13 = vpack.c.bf16 %v784_v8, %v783_v9  ;;  %v763_v14 = vadd.f32 %v1573_v27, %v762_v12 }
 0x3bd   :  { %v786_v15 = vmax.f32 %v768_v11, 0.0 }
 0x3be   :  { %v785_v16 = vmax.f32 %v763_v14, 0.0  ;;  %1313 = vmatpush3.bf16.msra.mxu1 %v1312_v13 }
 0x3bf   :  { %1314 = vmatprep.subr.bf16.mxu1 %v1320_v25 }
 0x3c0   :  { %v1315_v17 = vpack.c.bf16 %v786_v15, %v785_v16 }
 0x3c2   :  { %1316 = vmatpush3.bf16.msra.mxu1 %v1315_v17 }
 0x3c5   :  { %1219 = vmatmul.mubr.f32.vlgmr.msra.gmra.mrb[32].mxu1 %v787_v18 }
 0x498   :  { %v854_v19 = vpop.f32.mrb[32].mxu1 }
 0x499   :  { %859 = vst.msk [vmem:[%s1611_s7] sm:$0xff] %vm858_vm3, %v854_v19  ;;  %v1220_v20 = vpop.f32.mrb[33].mxu1 }

</bundles_post_ra>
